<compile_context>
chip_gen: v6e
topology: v6e:2x2x1
jax: 0.10.0
libtpu: 0.0.40
codegen_flags: <defaults>
</compile_context>

<pallas_src>
import functools

import jax
import jax.numpy as jnp
from jax.experimental import pallas as pl
from jax.experimental.pallas import tpu as pltpu


def _round_up(v: int, m: int) -> int:
    return ((v + m - 1) // m) * m


def _pick_tile(dim: int, cap: int, align: int) -> int:
    """Largest divisor of `dim` that is a multiple of `align` and <= cap.

    Assumes `dim` is a positive multiple of `align` (it is: we align first)."""
    cap = max(align, min(cap, dim))
    cap -= cap % align
    for t in range(cap, 0, -align):
        if dim % t == 0:
            return t
    return align


# ----------------------------- kernels ---------------------------------------

def _linear_kernel_resident(x_ref, w_ref, b_ref, o_ref):
    # x_ref: (tm, Kp), w_ref: (Kp, Np) resident, b_ref: (1, Np), o_ref: (tm, Np)
    o_ref[...] = (
        jnp.dot(x_ref[...], w_ref[...], preferred_element_type=jnp.float32)
        + b_ref[...]
    ).astype(o_ref.dtype)


def _linear_kernel_tiled_f32(x_ref, w_ref, b_ref, o_ref):
    # f32 output: accumulate directly into the resident output block.
    k = pl.program_id(2)

    @pl.when(k == 0)
    def _():
        o_ref[...] = jnp.broadcast_to(b_ref[...], o_ref.shape).astype(o_ref.dtype)

    o_ref[...] += jnp.dot(x_ref[...], w_ref[...], preferred_element_type=jnp.float32)


def _linear_kernel_tiled_acc(x_ref, w_ref, b_ref, o_ref, acc_ref):
    # Narrow output dtype: accumulate in an f32 VMEM scratch, store at the end.
    k = pl.program_id(2)

    @pl.when(k == 0)
    def _():
        acc_ref[...] = jnp.zeros_like(acc_ref)

    acc_ref[...] += jnp.dot(x_ref[...], w_ref[...], preferred_element_type=jnp.float32)

    @pl.when(k == pl.num_programs(2) - 1)
    def _():
        o_ref[...] = (acc_ref[...] + b_ref[...]).astype(o_ref.dtype)


# ----------------------------- wrapper ----------------------------------------

@functools.partial(
    jax.jit,
    static_argnames=("tm", "tn", "tk", "compute_dtype", "max_resident_bytes"),
)
def linear_classifier(x, weight, bias, *, tm=512, tn=512, tk=512,
                      compute_dtype=None,
                      max_resident_bytes=40 * 1024 * 1024):
    """Forward pass of LinearClassifier (nn.Linear semantics).

    x:      (batch, input_dim)
    weight: (output_dim, input_dim)   -- PyTorch nn.Linear convention
    bias:   (output_dim,)
    returns (batch, output_dim)
    """
    M, K = x.shape
    N, K2 = weight.shape
    assert K == K2, "input_dim mismatch"
    assert bias.shape == (N,), "bias shape mismatch"

    out_dtype = x.dtype
    cdt = jnp.dtype(compute_dtype) if compute_dtype is not None else jnp.dtype(x.dtype)

    # Align only to hardware (8, 128) tiles -- no tile-multiple over-padding.
    Mp = _round_up(M, 8)
    Kp = _round_up(K, 128)
    Np = _round_up(N, 128)

    # One-time HBM-side transpose to (K, N): standard MXU contraction in-kernel.
    w_t = weight.T

    # Pad only when actually needed (static checks; no-op for aligned shapes).
    x_p = x if (Mp == M and Kp == K) else jnp.pad(x, ((0, Mp - M), (0, Kp - K)))
    w_p = w_t if (Kp == K and Np == N) else jnp.pad(w_t, ((0, Kp - K), (0, Np - N)))
    b_p = (bias if Np == N else jnp.pad(bias, (0, Np - N))).reshape(1, Np)

    if x_p.dtype != cdt:
        x_p = x_p.astype(cdt)
    if w_p.dtype != cdt:
        w_p = w_p.astype(cdt)
    b_p = b_p.astype(jnp.float32)

    itemsize = cdt.itemsize
    out_itemsize = jnp.dtype(out_dtype).itemsize
    vmem_limit = 48 * 1024 * 1024  # safe on v7x (64 MiB), fine on v5e/v6e

    # ---------------- fast path: weight resident in VMEM ----------------------
    tm_f = _pick_tile(Mp, tm, 8)
    if Mp >= 16 and Mp // tm_f < 2:            # >=2 parallel blocks (v7x 2 TCs)
        tm_f = _pick_tile(Mp, max(8, tm_f // 2), 8)

    fast_bytes = (2 * (tm_f * Kp + Kp * Np) * itemsize
                  + 2 * tm_f * Np * out_itemsize
                  + 2 * Np * 4)
    if fast_bytes <= max_resident_bytes:
        cost = pl.CostEstimate(
            flops=2 * Mp * Kp * Np,
            transcendentals=0,
            bytes_accessed=itemsize * (Mp * Kp + Kp * Np)
                           + out_itemsize * Mp * Np + 4 * Np,
        )
        out_p = pl.pallas_call(
            _linear_kernel_resident,
            out_shape=jax.ShapeDtypeStruct((Mp, Np), out_dtype),
            grid_spec=pltpu.PrefetchScalarGridSpec(
                num_scalar_prefetch=0,
                grid=(Mp // tm_f,),
                in_specs=[
                    pl.BlockSpec((tm_f, Kp), lambda i: (i, 0)),   # x strip
                    pl.BlockSpec((Kp, Np), lambda i: (0, 0)),     # resident weight
                    pl.BlockSpec((1, Np), lambda i: (0, 0)),      # bias
                ],
                out_specs=pl.BlockSpec((tm_f, Np), lambda i: (i, 0)),
            ),
            compiler_params=pltpu.CompilerParams(
                dimension_semantics=("parallel",),
                vmem_limit_bytes=vmem_limit,
            ),
            cost_estimate=cost,
        )(x_p, w_p, b_p)
        return out_p[:M, :N]

    # ---------------- tiled path (large weights) -------------------------------
    tm_t = _pick_tile(Mp, tm, 8)
    tn_t = _pick_tile(Np, tn, 128)
    tk_t = _pick_tile(Kp, tk, 128)
    if Mp >= 16 and (Mp // tm_t) * (Np // tn_t) < 2:
        tm_t = _pick_tile(Mp, max(8, tm_t // 2), 8)

    grid = (Mp // tm_t, Np // tn_t, Kp // tk_t)

    cost = pl.CostEstimate(
        flops=2 * Mp * Kp * Np,
        transcendentals=0,
        bytes_accessed=(itemsize * (Mp * Kp * (Np // tn_t) + Kp * Np * (Mp // tm_t))
                        + out_itemsize * Mp * Np + 4 * Np),
    )

    acc_in_out = jnp.dtype(out_dtype) == jnp.float32
    kernel = _linear_kernel_tiled_f32 if acc_in_out else _linear_kernel_tiled_acc
    scratch = [] if acc_in_out else [pltpu.VMEM((tm_t, tn_t), jnp.float32)]

    out_p = pl.pallas_call(
        kernel,
        out_shape=jax.ShapeDtypeStruct((Mp, Np), out_dtype),
        grid_spec=pltpu.PrefetchScalarGridSpec(
            num_scalar_prefetch=0,
            grid=grid,
            in_specs=[
                pl.BlockSpec((tm_t, tk_t), lambda i, j, k: (i, k)),   # x tile
                pl.BlockSpec((tk_t, tn_t), lambda i, j, k: (k, j)),   # w (K,N) tile
                pl.BlockSpec((1, tn_t), lambda i, j, k: (0, j)),      # bias slice
            ],
            out_specs=pl.BlockSpec((tm_t, tn_t), lambda i, j, k: (i, j)),
            scratch_shapes=scratch,
        ),
        compiler_params=pltpu.CompilerParams(
            dimension_semantics=("parallel", "parallel", "arbitrary"),
            vmem_limit_bytes=vmem_limit,
        ),
        cost_estimate=cost,
    )(x_p, w_p, b_p)
    return out_p[:M, :N]


def init_linear_params(key, input_dim, output_dim, dtype=jnp.float32):
    """Deterministic init mimicking nn.Linear default (uniform +/- 1/sqrt(in))."""
    k_w, k_b = jax.random.split(key)
    bound = 1.0 / jnp.sqrt(jnp.float32(input_dim))
    weight = jax.random.uniform(
        k_w, (output_dim, input_dim), dtype, minval=-bound, maxval=bound
    )
    bias = jax.random.uniform(
        k_b, (output_dim,), dtype, minval=-bound, maxval=bound
    )
    return weight, bias


if __name__ == "__main__":
    key = jax.random.PRNGKey(0)
    k_x, k_p, k_x2, k_p2 = jax.random.split(key, 4)

    # --- small case (weight-resident fast path) -------------------------------
    batch, input_dim, output_dim = 8, 32, 16
    x = jax.random.normal(k_x, (batch, input_dim), dtype=jnp.float32)
    weight, bias = init_linear_params(k_p, input_dim, output_dim)

    out = linear_classifier(x, weight, bias)
    out = jax.block_until_ready(out)
    ref = x @ weight.T + bias
    assert out.shape == (batch, output_dim)
    assert jnp.allclose(out, ref, atol=1e-5, rtol=1e-5)

    # --- non-aligned case, forced tiled path (exercises K accumulation) -------
    b2, in2, out2 = 24, 160, 48
    x2 = jax.random.normal(k_x2, (b2, in2), dtype=jnp.float32)
    w2, bias2 = init_linear_params(k_p2, in2, out2)

    out_t = linear_classifier(x2, w2, bias2, tk=128, max_resident_bytes=0)
    out_t = jax.block_until_ready(out_t)
    ref_t = x2 @ w2.T + bias2
    assert out_t.shape == (b2, out2)
    assert jnp.allclose(out_t, ref_t, atol=1e-5, rtol=1e-5)

    print("KERNEL_OK")
</pallas_src>

<mosaic_0001>
module attributes {stable_mosaic.version = 11 : i64} {
  func.func @_linear_kernel_resident(%arg0: i32, %arg1: memref<8x128xf32, #tpu.memory_space<vmem>>, %arg2: memref<128x128xf32, #tpu.memory_space<vmem>>, %arg3: memref<1x128xf32, #tpu.memory_space<vmem>>, %arg4: memref<8x128xf32, #tpu.memory_space<vmem>>) attributes {dimension_semantics = [#tpu.dimension_semantics<parallel>], iteration_bounds = array<i64: 1>, scalar_prefetch = 0 : i64, scratch_operands = 0 : i64, tpu.core_type = #tpu.core_type<tc>, window_params = [{transform_indices = @transform_0, window_bounds = array<i64: 8, 128>}, {pipeline_mode = #tpu.pipeline_mode<synchronous>, transform_indices = @transform_1, window_bounds = array<i64: 128, 128>}, {pipeline_mode = #tpu.pipeline_mode<synchronous>, transform_indices = @transform_2, window_bounds = array<i64: 1, 128>}, {transform_indices = @transform_3, window_bounds = array<i64: 8, 128>}]} {
    %c0 = arith.constant 0 : index
    %c0_0 = arith.constant 0 : index
    %0 = vector.load %arg1[%c0, %c0_0] : memref<8x128xf32, #tpu.memory_space<vmem>>, vector<8x128xf32>
    %c0_1 = arith.constant 0 : index
    %c0_2 = arith.constant 0 : index
    %1 = vector.load %arg2[%c0_1, %c0_2] : memref<128x128xf32, #tpu.memory_space<vmem>>, vector<128x128xf32>
    %cst = arith.constant dense<0.000000e+00> : vector<8x128xf32>
    %2 = tpu.matmul %0, %1, %cst {dimension_numbers = #tpu.dot_dimension_numbers<[1], [0], [0], [1], [0, 0, 1, 1], [], []>} : vector<8x128xf32>, vector<128x128xf32>, vector<8x128xf32> -> vector<8x128xf32>
    %c0_3 = arith.constant 0 : index
    %c0_4 = arith.constant 0 : index
    %3 = vector.load %arg3[%c0_3, %c0_4] : memref<1x128xf32, #tpu.memory_space<vmem>>, vector<1x128xf32>
    %4 = vector.broadcast %3 : vector<1x128xf32> to vector<8x128xf32>
    %5 = arith.addf %2, %4 : vector<8x128xf32>
    %c0_5 = arith.constant 0 : index
    %c0_6 = arith.constant 0 : index
    %6 = vector.load %arg4[%c0_5, %c0_6] : memref<8x128xf32, #tpu.memory_space<vmem>>, vector<8x128xf32>
    tpu.vector_store %arg4[%c0_5, %c0_6], %5 {strides = array<i32>} : memref<8x128xf32, #tpu.memory_space<vmem>>, vector<8x128xf32>,
    return
  }
  func.func @transform_0(%arg0: i32) -> (i32, i32) {
    %c0_i32 = arith.constant 0 : i32
    %c0_i32_0 = arith.constant 0 : i32
    return %arg0, %c0_i32 : i32, i32
  }
  func.func @transform_1(%arg0: i32) -> (i32, i32) {
    %c0_i32 = arith.constant 0 : i32
    %c0_i32_0 = arith.constant 0 : i32
    %c0_i32_1 = arith.constant 0 : i32
    return %c0_i32, %c0_i32_0 : i32, i32
  }
  func.func @transform_2(%arg0: i32) -> (i32, i32) {
    %c0_i32 = arith.constant 0 : i32
    %c0_i32_0 = arith.constant 0 : i32
    %c0_i32_1 = arith.constant 0 : i32
    return %c0_i32, %c0_i32_0 : i32, i32
  }
  func.func @transform_3(%arg0: i32) -> (i32, i32) {
    %c0_i32 = arith.constant 0 : i32
    %c0_i32_0 = arith.constant 0 : i32
    return %arg0, %c0_i32 : i32, i32
  }
}

</mosaic_0001>

<bundles_post_ra>
// kernel: linear_classifier.1
= control target key start
LH: loop header
LB: loop body
LE: loop exit
PB: predicated region body
PF: predicated region fallthrough
CT: control target
= control target key end

     0   :  { %v202_v1 = vmov 0.0   ;;  %vm203_vm0 = vmmov 0   ;;  %s282_s0 = inlined_call_operand.vmem [shape: f32[8,128], index: 0, kind: input, shape index: {}]   ;;  %s283_s1 = inlined_call_operand.vmem [shape: f32[128,128], index: 1, kind: input, shape index: {}]   ;;  %s284_s2 = inlined_call_operand.vmem [shape: f32[1,128], index: 2, kind: input, shape index: {}]   ;;  %s285_s3 = inlined_call_operand.hbm [shape: f32[8,128], index: 3, kind: output, shape index: {}]  }
   0x1   :  { %v31_v0 = vld [vmem:[%s283_s1 + $0x78] sm:$0xff]  ;;  %142 = vmatprep.subr.mxu0 %v202_v1  ;;  %v30_v2 = vld [vmem:[%s283_s1 + $0x70] sm:$0xff]  ;;  %174 = vmatprep.mubr.msk.f32.mxu0 %vm203_vm0, %v202_v1  ;;  %v29_v3 = vld [vmem:[%s283_s1 + $0x68] sm:$0xff] }
   0x2   :  { %143 = vmatpush3.msra.mxu0 %v31_v0  ;;  %v28_v4 = vld [vmem:[%s283_s1 + $0x60] sm:$0xff] }
   0x3   :  { %144 = vmatprep.subr.mxu0 %v202_v1 }
   0x4   :  { %145 = vmatpush3.msra.mxu0 %v30_v2 }
   0x5   :  { %146 = vmatprep.subr.mxu0 %v202_v1 }
   0x6   :  { %147 = vmatpush3.msra.mxu0 %v29_v3 }
   0x7   :  { %8 = vsyncpa [#allocation3], 0  ;;  %148 = vmatprep.subr.mxu0 %v202_v1  ;;  %v27_v5 = vld [vmem:[%s283_s1 + $0x58] sm:$0xff]  ;;  %v26_v6 = vld [vmem:[%s283_s1 + $0x50] sm:$0xff]  ;;  %s204_s21 = smov [#allocation2]  }
   0x8   :  { %149 = vmatpush3.msra.mxu0 %v28_v4  ;;  %v25_v7 = vld [vmem:[%s283_s1 + $0x48] sm:$0xff]  ;;  %v24_v8 = vld [vmem:[%s283_s1 + $0x40] sm:$0xff]  ;;  %v23_v9 = vld [vmem:[%s283_s1 + $0x38] sm:$0xff]  ;;  %s116_s22 = sshll.u32 %s204_s21, 4  ;;  %s117_s22 = int_to_ptr.vmem [resolvable:$true] %s116_s22 }
   0x9   :  { %150 = vmatprep.subr.mxu0 %v202_v1  ;;  %v22_v10 = vld [vmem:[%s283_s1 + $0x30] sm:$0xff]  ;;  %v21_v11 = vld [vmem:[%s283_s1 + $0x28] sm:$0xff]  ;;  %v20_v12 = vld [vmem:[%s283_s1 + $0x20] sm:$0xff]  ;;  %p185_p1 = scmp.lt.s32.totalorder %s117_s22, %s117_s22 }
   0xa   :  { %151 = vmatpush3.msra.mxu0 %v27_v5  ;;  %v19_v13 = vld [vmem:[%s283_s1 + $0x18] sm:$0xff]  ;;  %v18_v14 = vld [vmem:[%s283_s1 + $0x10] sm:$0xff]  ;;  %v17_v15 = vld [vmem:[%s283_s1 + $0x8] sm:$0xff] }
   0xb   :  { %152 = vmatprep.subr.mxu0 %v202_v1  ;;  %v16_v16 = vld [vmem:[%s283_s1] sm:$0xff]  ;;  %s180_s1 = scalar_lea.vmem %s117_s22, 128 }
   0xc   :  { %153 = vmatpush3.msra.mxu0 %v26_v6  ;;  %v15_v17 = vld [vmem:[%s282_s0] sm:$0xff]  ;;  %p181_p0 = scmp.ne.s32.totalorder %s117_s22, %s180_s1  ;;  %p186_p2 = scmp.lt.s32.totalorder %s180_s1, %s180_s1 }
   0xd   :  { %154 = vmatprep.subr.mxu0 %v202_v1  ;;  %v124_v18 = vld [vmem:[%s284_s2] ss:$0 sm:$0xff] }
   0xe   :  { %155 = vmatpush3.msra.mxu0 %v25_v7  ;;  %p187_p3 = por %p186_p2, %p185_p1 }
   0xf   :  { %156 = vmatprep.subr.mxu0 %v202_v1 }
  0x10   :  { %157 = vmatpush3.msra.mxu0 %v24_v8  ;;  %p188_p4 = pnand %p187_p3, %p181_p0 }
  0x11   :  { %158 = vmatprep.subr.mxu0 %v202_v1 }
  0x12   :  { %159 = vmatpush3.msra.mxu0 %v23_v9 }
  0x13   :  { %160 = vmatprep.subr.mxu0 %v202_v1 }
  0x14   :  { %161 = vmatpush3.msra.mxu0 %v22_v10 }
  0x15   :  { %162 = vmatprep.subr.mxu0 %v202_v1 }
  0x16   :  { %163 = vmatpush3.msra.mxu0 %v21_v11 }
  0x17   :  { %164 = vmatprep.subr.mxu0 %v202_v1 }
  0x18   :  { %165 = vmatpush3.msra.mxu0 %v20_v12 }
  0x19   :  { %166 = vmatprep.subr.mxu0 %v202_v1 }
  0x1a   :  { %167 = vmatpush3.msra.mxu0 %v19_v13 }
  0x1b   :  { %168 = vmatprep.subr.mxu0 %v202_v1 }
  0x1c   :  { %169 = vmatpush3.msra.mxu0 %v18_v14 }
  0x1d   :  { %170 = vmatprep.subr.mxu0 %v202_v1 }
  0x1e   :  { %171 = vmatpush3.msra.mxu0 %v17_v15 }
  0x1f   :  { %172 = vmatprep.subr.mxu0 %v202_v1 }
  0x20   :  { %173 = vmatpush3.msra.mxu0 %v16_v16 }
  0x21   :  { %175 = vmatmul.mubr.f32.vlgmr.msra.gmra.mxu0 %v15_v17 }
  0xe1   :  { %v105_v19 = vpop.f32.mrf.mxu0 }
  0xe2   :  { %v106_v20 = vadd.f32 %v124_v18, %v105_v19 }
  0xe3   :  { %v176_v21 = vpop.f32.mrf.mxu0 }
  0xe4   :  { %109 = vst [vmem:[#allocation2] sm:$0xff] %v106_v20 }
  0xe5   :  { %191 = shalt.err (!%p188_p4)
}
  0xe6   :  { %119 = dma.vmem_to_hbm [thread:$0]  %s117_s22, 128, %s285_s3, [#allocation3]  }
  0xe7   :  { %200 = dma.done.wait [#allocation3], 128  }
  0xe8   :  { %201 = vsyncadd [#allocation3], 4294967168 }
  0xe9   :  { %123 = vsyncpa [#allocation3], 1 }

</bundles_post_ra>
